<compile_context>
chip_gen: v6e
topology: v6e:2x2x1
jax: 0.10.0
libtpu: 0.0.40
codegen_flags: <defaults>
</compile_context>

<pallas_src>
import jax
import jax.numpy as jnp
from jax.experimental import pallas as pl
from jax.experimental.pallas import tpu as pltpu


def _round_up(n, m):
    return ((n + m - 1) // m) * m


def mlp_kernel(x_ref, w1_ref, b1_ref, w2_ref, b2_ref, o_ref):
    # fc1: (TB, F) @ (F, H) -> f32 accumulate on the MXU (all-f32, matches torch).
    h = jnp.dot(x_ref[...], w1_ref[...], preferred_element_type=jnp.float32)
    h = jnp.maximum(h + b1_ref[...], 0.0)          # bias + ReLU on the VPU
    # fc2: (TB, H) @ (H, C) with H=10, C=2 — tiny vs. the memory-bound fc1.
    out = jnp.dot(h, w2_ref[...], preferred_element_type=jnp.float32)
    o_ref[...] = (out + b2_ref[...]).astype(o_ref.dtype)


def nn_forward(x, w1, b1, w2, b2, *, tb=8192):
    """Pallas implementation of NN.forward: fc2(relu(fc1(x))).

    x:  (B, F) f32
    w1: (F, H), b1: (H,)   -- fc1 params (weight transposed vs. torch Linear)
    w2: (H, C), b2: (C,)   -- fc2 params
    """
    B, F = x.shape
    H = w1.shape[1]
    C = w2.shape[1]

    # Batch tile: multiple of 8 (sublane), capped so that (a) it never exceeds the
    # requested tb and (b) the grid has >= 2 steps whenever B > 8 (keeps both v7x
    # TensorCores busy via the "parallel" batch axis). No padding of x: the cdiv
    # grid lets Pallas handle the ragged last block (rows are independent; the
    # out-of-bounds part of the boundary write is masked by Pallas).
    half = _round_up(pl.cdiv(B, 2), 8)
    TB = max(8, min(_round_up(tb, 8), half))
    grid = (pl.cdiv(B, TB),)

    x_f = x.astype(jnp.float32)
    w1_f = w1.astype(jnp.float32)
    w2_f = w2.astype(jnp.float32)
    b1_2d = b1.reshape(1, H).astype(jnp.float32)
    b2_2d = b2.reshape(1, C).astype(jnp.float32)

    # Advisory cost hint: clearly memory-bound on x.
    flops = int(2 * B * (F * H + H * C))
    bytes_accessed = int(4 * (B * F + B * C + F * H + H + H * C + C))

    out = pl.pallas_call(
        mlp_kernel,
        out_shape=jax.ShapeDtypeStruct((B, C), jnp.float32),
        grid=grid,
        in_specs=[
            pl.BlockSpec((TB, F), lambda i: (i, 0)),   # x: streamed per tile
            pl.BlockSpec((F, H), lambda i: (0, 0)),    # w1: VMEM-resident
            pl.BlockSpec((1, H), lambda i: (0, 0)),    # b1: VMEM-resident
            pl.BlockSpec((H, C), lambda i: (0, 0)),    # w2: VMEM-resident
            pl.BlockSpec((1, C), lambda i: (0, 0)),    # b2: VMEM-resident
        ],
        out_specs=pl.BlockSpec((TB, C), lambda i: (i, 0)),
        compiler_params=pltpu.CompilerParams(
            dimension_semantics=("parallel",),
        ),
        cost_estimate=pl.CostEstimate(
            flops=flops, transcendentals=0, bytes_accessed=bytes_accessed),
    )(x_f, w1_f, b1_2d, w2_f, b2_2d)

    return out


# TODO(synk): fit() (CrossEntropyLoss + SGD training loop) and predict() (argmax)
# are host-side training/inference drivers, not part of the forward kernel.

if __name__ == "__main__":
    key = jax.random.PRNGKey(0)
    batch = 20            # not a multiple of 8/16 -> exercises the ragged last block
    input_features = 32
    hidden = 10           # fc1 out
    n_cls = 2             # fc2 out

    kx, k1, kb1, k2, kb2 = jax.random.split(key, 5)
    x = jax.random.normal(kx, (batch, input_features), dtype=jnp.float32)

    # Deterministic parameter init (PyTorch-Linear-like uniform bounds).
    bound1 = 1.0 / jnp.sqrt(input_features)
    w1 = jax.random.uniform(k1, (input_features, hidden), jnp.float32, -bound1, bound1)
    b1 = jax.random.uniform(kb1, (hidden,), jnp.float32, -bound1, bound1)
    bound2 = 1.0 / jnp.sqrt(hidden)
    w2 = jax.random.uniform(k2, (hidden, n_cls), jnp.float32, -bound2, bound2)
    b2 = jax.random.uniform(kb2, (n_cls,), jnp.float32, -bound2, bound2)

    # Default tb gets clamped to TB=16 here -> grid of 2 steps + a ragged block.
    out = nn_forward(x, w1, b1, w2, b2)
    jax.block_until_ready(out)

    # Full-f32 reference (same math as torch: fc2(relu(fc1(x)))).
    ref = jnp.maximum(x @ w1 + b1, 0.0) @ w2 + b2

    assert out.shape == (batch, n_cls)
    assert jnp.allclose(out, ref, atol=1e-4, rtol=1e-4)

    print("KERNEL_OK")
</pallas_src>

<mosaic_0001>
module attributes {stable_mosaic.version = 11 : i64} {
  func.func @mlp_kernel(%arg0: i32, %arg1: memref<16x32xf32, #tpu.memory_space<vmem>>, %arg2: memref<32x10xf32, #tpu.memory_space<vmem>>, %arg3: memref<1x10xf32, #tpu.memory_space<vmem>>, %arg4: memref<10x2xf32, #tpu.memory_space<vmem>>, %arg5: memref<1x2xf32, #tpu.memory_space<vmem>>, %arg6: memref<16x2xf32, #tpu.memory_space<vmem>>) attributes {dimension_semantics = [#tpu.dimension_semantics<parallel>], iteration_bounds = array<i64: 2>, scalar_prefetch = 0 : i64, scratch_operands = 0 : i64, tpu.core_type = #tpu.core_type<tc>, window_params = [{transform_indices = @transform_0, window_bounds = array<i64: 16, 32>}, {pipeline_mode = #tpu.pipeline_mode<synchronous>, transform_indices = @transform_1, window_bounds = array<i64: 32, 10>}, {pipeline_mode = #tpu.pipeline_mode<synchronous>, transform_indices = @transform_2, window_bounds = array<i64: 1, 10>}, {pipeline_mode = #tpu.pipeline_mode<synchronous>, transform_indices = @transform_3, window_bounds = array<i64: 10, 2>}, {pipeline_mode = #tpu.pipeline_mode<synchronous>, transform_indices = @transform_4, window_bounds = array<i64: 1, 2>}, {transform_indices = @transform_5, window_bounds = array<i64: 16, 2>}]} {
    %c0 = arith.constant 0 : index
    %c0_0 = arith.constant 0 : index
    %0 = vector.load %arg1[%c0, %c0_0] : memref<16x32xf32, #tpu.memory_space<vmem>>, vector<16x32xf32>
    %c0_1 = arith.constant 0 : index
    %c0_2 = arith.constant 0 : index
    %1 = vector.load %arg2[%c0_1, %c0_2] : memref<32x10xf32, #tpu.memory_space<vmem>>, vector<32x10xf32>
    %cst = arith.constant dense<0.000000e+00> : vector<16x10xf32>
    %2 = tpu.matmul %0, %1, %cst {dimension_numbers = #tpu.dot_dimension_numbers<[1], [0], [0], [1], [0, 0, 1, 1], [], []>} : vector<16x32xf32>, vector<32x10xf32>, vector<16x10xf32> -> vector<16x10xf32>
    %c0_3 = arith.constant 0 : index
    %c0_4 = arith.constant 0 : index
    %3 = vector.load %arg3[%c0_3, %c0_4] : memref<1x10xf32, #tpu.memory_space<vmem>>, vector<1x10xf32>
    %4 = vector.broadcast %3 : vector<1x10xf32> to vector<16x10xf32>
    %5 = arith.addf %2, %4 : vector<16x10xf32>
    %cst_5 = arith.constant 0.000000e+00 : f32
    %6 = vector.broadcast %cst_5 : f32 to vector<16x10xf32>
    %7 = arith.maximumf %5, %6 : vector<16x10xf32>
    %c0_6 = arith.constant 0 : index
    %c0_7 = arith.constant 0 : index
    %8 = vector.load %arg4[%c0_6, %c0_7] : memref<10x2xf32, #tpu.memory_space<vmem>>, vector<10x2xf32>
    %cst_8 = arith.constant dense<0.000000e+00> : vector<16x2xf32>
    %9 = tpu.matmul %7, %8, %cst_8 {dimension_numbers = #tpu.dot_dimension_numbers<[1], [0], [0], [1], [0, 0, 1, 1], [], []>} : vector<16x10xf32>, vector<10x2xf32>, vector<16x2xf32> -> vector<16x2xf32>
    %c0_9 = arith.constant 0 : index
    %c0_10 = arith.constant 0 : index
    %10 = vector.load %arg5[%c0_9, %c0_10] : memref<1x2xf32, #tpu.memory_space<vmem>>, vector<1x2xf32>
    %11 = vector.broadcast %10 : vector<1x2xf32> to vector<16x2xf32>
    %12 = arith.addf %9, %11 : vector<16x2xf32>
    %c0_11 = arith.constant 0 : index
    %c0_12 = arith.constant 0 : index
    %13 = vector.load %arg6[%c0_11, %c0_12] : memref<16x2xf32, #tpu.memory_space<vmem>>, vector<16x2xf32>
    tpu.vector_store %arg6[%c0_11, %c0_12], %12 {strides = array<i32>} : memref<16x2xf32, #tpu.memory_space<vmem>>, vector<16x2xf32>,
    return
  }
  func.func @transform_0(%arg0: i32) -> (i32, i32) {
    %c0_i32 = arith.constant 0 : i32
    %c0_i32_0 = arith.constant 0 : i32
    return %arg0, %c0_i32 : i32, i32
  }
  func.func @transform_1(%arg0: i32) -> (i32, i32) {
    %c0_i32 = arith.constant 0 : i32
    %c0_i32_0 = arith.constant 0 : i32
    %c0_i32_1 = arith.constant 0 : i32
    return %c0_i32, %c0_i32_0 : i32, i32
  }
  func.func @transform_2(%arg0: i32) -> (i32, i32) {
    %c0_i32 = arith.constant 0 : i32
    %c0_i32_0 = arith.constant 0 : i32
    %c0_i32_1 = arith.constant 0 : i32
    return %c0_i32, %c0_i32_0 : i32, i32
  }
  func.func @transform_3(%arg0: i32) -> (i32, i32) {
    %c0_i32 = arith.constant 0 : i32
    %c0_i32_0 = arith.constant 0 : i32
    %c0_i32_1 = arith.constant 0 : i32
    return %c0_i32, %c0_i32_0 : i32, i32
  }
  func.func @transform_4(%arg0: i32) -> (i32, i32) {
    %c0_i32 = arith.constant 0 : i32
    %c0_i32_0 = arith.constant 0 : i32
    %c0_i32_1 = arith.constant 0 : i32
    return %c0_i32, %c0_i32_0 : i32, i32
  }
  func.func @transform_5(%arg0: i32) -> (i32, i32) {
    %c0_i32 = arith.constant 0 : i32
    %c0_i32_0 = arith.constant 0 : i32
    return %arg0, %c0_i32 : i32, i32
  }
}

</mosaic_0001>

<bundles_post_ra>
// kernel: tpu_custom_call.1
= control target key start
LH: loop header
LB: loop body
LE: loop exit
PB: predicated region body
PF: predicated region fallthrough
CT: control target
= control target key end

     0   :  { %s929_s18 = smov 0   ;;  %s931_s19 = smov 0   ;;  %s1036_s0 = inlined_call_operand.vmem [shape: f32[20,32], index: 0, kind: input, shape index: {}]   ;;  %s1037_s1 = inlined_call_operand.vmem [shape: f32[32,10], index: 1, kind: input, shape index: {}]   ;;  %s1038_s2 = inlined_call_operand.vmem [shape: f32[1,10], index: 2, kind: input, shape index: {}]   ;;  %s1039_s3 = inlined_call_operand.vmem [shape: f32[10,2], index: 3, kind: input, shape index: {}]   ;;  %s1040_s4 = inlined_call_operand.vmem [shape: f32[1,2], index: 4, kind: input, shape index: {}]   ;;  %s1041_s5 = inlined_call_operand.vmem [shape: f32[20,2], index: 5, kind: output, shape index: {}]  }
   0x1   :  { %s933_s20 = smov 0  }
   0x2 LB: > { %s942_s21 = sadd.s32 4294967295, %s865_s20   ;;  %s944_s22 = sadd.s32 1, %s865_s20   ;;  %s865_s20 = sphi %s933_s20, %s1045_s20   ;;  %s861_s19 = sphi %s931_s19, %s1044_s19   ;;  %s857_s18 = sphi %s929_s18, %s1043_s18  }
   0x3   : > { %s129_s23 = ssub.s32 %s865_s20, %s944_s22  ;;  %s132_s24 = sadd.s32 1, %s861_s19 }
   0x4   : > { %p130_p0 = scmp.eq.s32.totalorder %s129_s23, 0  ;;  %p142_p1 = scmp.ne.s32.totalorder %s861_s19, %s857_s18 }
   0x5   : > { %p143_p2 = scmp.eq.s32.totalorder %s942_s21, 1  ;;  %p664_p3 = scmp.ge.s32.totalorder %s865_s20, 1 }
   0x6   : > { %s952_s25 = scalar_select %p130_p0, %s861_s19, %s132_s24  }
   0x7   : > { %p954_p4 = por %p143_p2, %p142_p1  ;;  %p196_p5 = scmp.lt.s32.totalorder %s865_s20, 3 }
   0x9   : > { %p197_p6 = pnand %p664_p3, %p196_p5 }
   0xa   : > { %s965_s6 = sshll.u32 (!%p197_p6), %s942_s21, 1  ;;  %s224_s28 = sand.u32 (!%p197_p6), 1, %s857_s18  }
   0xb   : > { %200 = sbr.rel (%p197_p6) target bundleno = 462 (0x1ce), region = 40  ;;  %p232_p7 = scmp.lt.s32.totalorder (!%p197_p6), %s965_s6, 2 }
   0xc   : > { %s665_s29 = sshll.u32 (!%p197_p6), %s224_s28, 4 }
   0xd   : > { %s991_s8 = scalar_lea.vmem (!%p197_p6), [#allocation2], %s665_s29  }
  0x10   : > { %v251_v0 = vld [vmem:[%s1037_s1 + $0x18] sm:$0xff]  ;;  %v250_v1 = vld [vmem:[%s1037_s1 + $0x10] sm:$0xff]  ;;  %v249_v2 = vld [vmem:[%s1037_s1 + $0x8] sm:$0xff]  ;;  %s233_s9 = scalar_select %p232_p7, %s965_s6, 2  ;;  %vm259_vm0 = vcmask 261120   ;;  %vm359_vm1 = vcmask 1041408  }
  0x11   : > { %705 = vmatprep.subr.mxu0 %v251_v0  ;;  %v248_v3 = vld [vmem:[%s1037_s1] sm:$0xff]  ;;  %v344_v6 = vld [vmem:[%s1039_s3 + $0x8] sm:$0x3]  ;;  %vm352_vm2 = vcmask 80896   ;;  %vm438_vm3 = vcmask 15360   ;;  %s449_s18 = ssub.s32 (%p954_p4), 3, %s965_s6 }
  0x12   : > { %706 = vmatpush3.msra.mxu0 %v251_v0  ;;  %s667_s12 = sshll.u32 %s233_s9, 3  ;;  %716 = vmatprep.subr.msk.mxu1 %vm359_vm1, %v344_v6  ;;  %v343_v7 = vld [vmem:[%s1039_s3] sm:$0xff]  ;;  %s692_s9 = sshll.u32 (%p954_p4), %s942_s21, 4 }
  0x13   : > { %707 = vmatprep.subr.mxu0 %v250_v1  ;;  %s235_s15 = scalar_lea.vmem %s1036_s0, %s667_s12  ;;  %717 = vmatpush3.msk.msra.mxu1 %vm359_vm1, %v344_v6  ;;  %v668_v8 = vld [vmem:[%s1038_s2] ss:$0 sm:$0xff]  ;;  %p450_p8 = scmp.lt.s32.totalorder (%p954_p4), %s449_s18, 2 }
  0x14   : > { %708 = vmatpush3.msra.mxu0 %v250_v1  ;;  %v246_v4 = vld [vmem:[%s235_s15] sm:$0xff]  ;;  %v247_v5 = vld [vmem:[%s235_s15 + $0x8] sm:$0xff]  ;;  %718 = vmatprep.subr.mxu1 %v343_v7  ;;  %s1002_s12 = scalar_lea.vmem (%p954_p4), %s1041_s5, %s692_s9  }
  0x15   : > { %709 = vmatprep.subr.mxu0 %v249_v2  ;;  %713 = vmatprep.mubr.msk.f32.mxu0 %vm259_vm0, %v246_v4  ;;  %v671_v15 = vld [vmem:[%s1040_s4] ss:$0 sm:$0xff] }
  0x16   : > { %710 = vmatpush3.msra.mxu0 %v249_v2  ;;  %719 = vmatpush3.msra.mxu1 %v343_v7 }
  0x17   : > { %711 = vmatprep.subr.mxu0 %v248_v3 }
  0x18   : > { %712 = vmatpush3.msra.mxu0 %v248_v3 }
  0x19   : > { %714 = vmatmul.mubr.msk.f32.vlgmr.msra.gmra.mxu0 %vm259_vm0, %v247_v5 }
  0xd9   : > { %v715_v9 = vpop.f32.mrf.mxu0 }
  0xda   : > { %v338_v10 = vadd.f32 %v715_v9, %v668_v8 }
  0xdb   : > { %v332_v11 = vpop.f32.mrf.mxu0 }
  0xdc   : > { %v333_v12 = vadd.f32 %v668_v8, %v332_v11  ;;  %v342_v14 = vmax.f32 %v338_v10, 0.0 }
  0xde   : > { %v341_v13 = vmax.f32 %v333_v12, 0.0 }
  0xe0   : > { %720 = vmatprep.mubr.msk.f32.mxu1 %vm352_vm2, %v341_v13 }
  0xe1   : > { %721 = vmatmul.mubr.msk.f32.vlgmr.msra.gmra.mxu1 %vm352_vm2, %v342_v14 }
 0x1a1   : > { %v722_v16 = vpop.f32.mrf.mxu1 }
 0x1a2   : > { %v435_v17 = vadd.f32 %v722_v16, %v671_v15  ;;  %447 = sbr.rel (!%p954_p4) target bundleno = 462 (0x1ce), region = 44 }
 0x1a3   : > { %v429_v18 = vpop.f32.mrf.mxu1 }
 0x1a4   : > { %440 = vst.msk [vmem:[%s991_s8 + $0x8] sm:$0xff] %vm438_vm3, %v435_v17  ;;  %v430_v19 = vadd.f32 %v671_v15, %v429_v18 }
 0x1a6   : > { %439 = vst.msk [vmem:[%s991_s8] sm:$0xff] %vm438_vm3, %v430_v19 }
 0x1a7   : > { %s1047_s18 = smov (!%p450_p8, %s449_s18), 2 }
 0x1a8   : > { %s677_s13 = sshll.u32 %s1047_s18, 7 }
 0x1a9   : > { %p680_p9 = scmp.eq.s32.totalorder %s677_s13, 0 }
 0x1aa   : > { %s1008_s14 = sshrl.u32 (!%p680_p9), %s1047_s18, 1 }
 0x1ab   : > { %458 = sbr.rel (%p680_p9) target bundleno = 462 (0x1ce), region = 48  ;;  %p681_p10 = scmp.le.s32.totalorder (!%p680_p9), %s1008_s14, 0 }
 0x1b0   : > { %617 = sbr.rel (%p681_p10) target bundleno = 445 (0x1bd), region = 124  ;;  %s867_s21 = smov (!%p681_p10), %s1002_s12  }
 0x1b1   : > { %s871_s26 = smov (!%p681_p10), %s991_s8   ;;  %s875_s6 = smov (!%p681_p10), 0  }
 0x1b2   : > { %s879_s15 = smov (!%p681_p10), 0  }
 0x1b5 LB: >> { %v523_v20 = vld [vmem:[%s873_s26] sm:$0xff]  ;;  %v525_v21 = vld [vmem:[%s873_s26 + $0x8] sm:$0xff]  ;;  %s527_s16 = sadd.s32 1, %s877_s6  ;;  %s517_s15 = sadd.s32 1, %s881_s15   ;;  %s881_s15 = sphi %s879_s15, %s517_s15   ;;  %s877_s6 = sphi %s875_s6, %s876_s6   ;;  %s873_s26 = sphi %s871_s26, %s532_s26   ;;  %s869_s21 = sphi %s867_s21, %s533_s21  }
 0x1b6   : >> { %524 = vst [vmem:[%s869_s21] sm:$0xff] %v523_v20  ;;  %526 = vst [vmem:[%s869_s21 + $0x8] sm:$0xff] %v525_v21  ;;  %p528_p11 = scmp.ge.s32.totalorder %s527_s16, %s1008_s14  ;;  %p516_p12 = scmp.ge.s32.totalorder %s517_s15, %s1008_s14 }
 0x1b8   : >> { %s1049_s16 = smov (%p528_p11, %s527_s16), 0  ;;  %519 = sbr.rel (!%p516_p12) target bundleno = 437 (0x1b5), region = 130 }
 0x1b9   : >> { %s682_s17 = sshll.u32 %s1049_s16, 4  ;;  %s876_s6 = smov %s1049_s16  }
 0x1ba   : >> { %s532_s26 = scalar_lea.vmem %s991_s8, %s682_s17 [#allocation2]   ;;  %s533_s21 = scalar_lea.vmem %s1002_s12, %s682_s17  }
 0x1bd PF: > { %s1018_s20 = sand.u32 1, %s1047_s18   ;;  %s693_s23 = sshll.u32 %s1008_s14, 4 }
 0x1be   : > { %s538_s24 = scalar_lea.vmem %s991_s8, %s693_s23 [#allocation2]   ;;  %s540_s27 = scalar_lea.vmem %s1002_s12, %s693_s23  }
 0x1bf   : > { %p687_p13 = scmp.le.s32.totalorder %s1018_s20, 0 }
 0x1c0   : > { %s883_s28 = smov (!%p687_p13), %s540_s27   ;;  %s887_s29 = smov (!%p687_p13), %s538_s24  }
 0x1c1   : > { %631 = sbr.rel (%p687_p13) target bundleno = 462 (0x1ce), region = 135  ;;  %s891_s30 = smov (!%p687_p13), 0  }
 0x1c2   : > { %s895_s7 = smov (!%p687_p13), 0  }
 0x1c6 LB: >> { %v550_v22 = vld [vmem:[%s889_s29] sm:$0xff]  ;;  %s552_s18 = sadd.s32 1, %s893_s30  ;;  %s544_s7 = sadd.s32 1, %s897_s7   ;;  %s897_s7 = sphi %s895_s7, %s544_s7   ;;  %s893_s30 = sphi %s891_s30, %s892_s30   ;;  %s889_s29 = sphi %s887_s29, %s557_s29   ;;  %s885_s28 = sphi %s883_s28, %s558_s28  }
 0x1c7   : >> { %551 = vst [vmem:[%s885_s28] sm:$0xff] %v550_v22  ;;  %p553_p0 = scmp.ge.s32.totalorder %s552_s18, %s1018_s20  ;;  %p543_p1 = scmp.ge.s32.totalorder %s544_s7, %s1018_s20 }
 0x1c9   : >> { %s1051_s18 = smov (%p553_p0, %s552_s18), 0  ;;  %546 = sbr.rel (!%p543_p1) target bundleno = 454 (0x1c6), region = 141 }
 0x1ca   : >> { %s688_s8 = sshll.u32 %s1051_s18, 3  ;;  %s892_s30 = smov %s1051_s18  }
 0x1cb   : >> { %s557_s29 = scalar_lea.vmem %s538_s24, %s688_s8 [#allocation2]   ;;  %s558_s28 = scalar_lea.vmem %s540_s27, %s688_s8  }
 0x1ce PF: > { %p12_p2 = scmp.ge.s32.totalorder %s944_s22, 4   ;;  %s1043_s18 = smov %s861_s19 }
 0x1cf   : > { %s1044_s19 = smov %s952_s25  ;;  %s1045_s20 = smov %s944_s22 }
 0x1d0   :  { %14 = sbr.rel (!%p12_p2) target bundleno = 2 (0x2), region = 152 }

</bundles_post_ra>
